<compile_context>
chip_gen: v7x
topology: tpu7x:2x2x1
jax: 0.10.0
libtpu: 0.0.40
codegen_flags: <defaults>
</compile_context>

<pallas_src>
import jax
import jax.numpy as jnp
from jax import lax
from jax.experimental import pallas as pl
from jax.experimental.pallas import tpu as pltpu


def _entity_memory_kernel(q_ref, h_ref, wqp_ref, bqp_ref, wc_ref, bc_ref,
                          out_ref, uh_ref):
    # q_ref  : (TB, dim)     -- queries of this batch tile
    # h_ref  : (TB * S, E)   -- entity rows, batch-major (row = b_local * S + s)
    # wqp_ref: (dim, 3E), bqp_ref: (1, 3E)  -- fused [gamma | query | h] projection
    # wc_ref : (E, E), bc_ref: (1, E)       -- linear_context
    # out_ref: (S, TB, E)    -- output already in [src_len, batch, E] layout
    # uh_ref : (TB * S, E)   -- f32 VMEM scratch holding H @ Wc + bc
    S, TB, E = out_ref.shape
    f32 = jnp.float32

    # (1) Context projection of ALL rows in this tile with one big MXU matmul
    #     (instead of S tiny matmuls inside the loop), staged in VMEM scratch.
    uh_ref[...] = (
        jnp.dot(h_ref[...], wc_ref[...], preferred_element_type=f32)
        + bc_ref[...].astype(f32))

    # (2) One fused, batched MXU matmul for all three query-side projections,
    #     computed once per batch tile (never per source position).
    proj = jnp.dot(q_ref[...], wqp_ref[...], preferred_element_type=f32)
    proj = proj + bqp_ref[...].astype(f32)                      # (TB, 3E)
    gamma = jax.nn.sigmoid(proj[:, 0:E])                        # (TB, E)
    wq = proj[:, E:2 * E]                                       # (TB, E)
    hproj = proj[:, 2 * E:3 * E]                                # (TB, E)

    # (3) Light per-source loop: strided sublane gather of the TB rows at source
    #     position s (same pattern for H and the precomputed uh), VPU blend, and
    #     a lane-dense store that lands contiguously at out_ref[s], giving the
    #     [S, B, E] output layout for free.
    def per_source(s, carry):
        h_s = h_ref[pl.ds(s, TB, stride=S), :]                  # (TB, E)
        uh_s = uh_ref[pl.ds(s, TB, stride=S), :]                # (TB, E)
        delta = gamma * jax.nn.sigmoid(wq + uh_s)               # (TB, E)
        h_f = h_s.astype(f32)
        out = h_f + delta * (hproj - h_f)   # == (1 - delta) * H + delta * hproj
        out_ref[s] = out.astype(out_ref.dtype)
        return carry

    lax.fori_loop(0, S, per_source, 0, unroll=S <= 16)


def _choose_batch_tile(batch, src_len, entity_dim, itemsize,
                       budget_bytes=4 << 20):
    """Batch elements per grid step.

    VMEM budget per grid step ~= 2x(in block) + 2x(out block) + f32 scratch,
    i.e. <= 5 * budget_bytes ~= 20 MiB for f32 data, comfortably inside the
    32 MiB limit requested below on every TPU generation.
    The (TB, dim) query block needs TB % 8 == 0 unless TB == batch, and TB must
    divide batch so no partial blocks are generated.
    """
    per_batch_bytes = src_len * entity_dim * itemsize
    fit = max(1, budget_bytes // max(per_batch_bytes, 1))
    if fit >= batch:
        return batch
    tb = (min(fit, batch) // 8) * 8
    while tb >= 8 and batch % tb != 0:
        tb -= 8
    return tb if tb >= 8 else batch


def entity_memory_updation(inp, entity, params, *, batch_tile=None):
    """Forward pass of EntityMemoryUpdation.

    Args:
      inp:    query, [B, dim] or [B, 1, dim] (one-step, tgt_len == 1).
      entity: entity memory, [B, S, entity_dim].
      params: weights stored [in_features, out_features], 1-D biases.
    Returns:
      Updated entity memory in the PyTorch layout [S, B, entity_dim].
    """
    if inp.ndim == 3:
        assert inp.shape[1] == 1, "only one-step queries (tgt_len == 1) supported"
        inp = inp[:, 0, :]
    B, dim = inp.shape
    Bh, S, E = entity.shape
    assert B == Bh

    wq, bq = params["w_query"], params["b_query"]
    wc, bc = params["w_context"], params["b_context"]
    wg, bg = params["w_gamma"], params["b_gamma"]
    wh = params["w_h"]

    # Fuse the three query-side projections into one (dim, 3E) weight:
    # columns [0:E) -> gamma, [E:2E) -> query, [2E:3E) -> h (bias-free).
    w_qpack = jnp.concatenate([wg, wq, wh], axis=1)                      # (dim, 3E)
    b_qpack = jnp.concatenate(
        [bg.reshape(-1), bq.reshape(-1), jnp.zeros((E,), bq.dtype)])[None, :]
    bc2 = bc.reshape(1, E)

    # Row-major flatten (free): row i*S + s  <->  (batch i, source position s).
    entity2d = entity.reshape(B * S, E)

    TB = batch_tile if batch_tile is not None else _choose_batch_tile(
        B, S, E, entity.dtype.itemsize)
    assert B % TB == 0 and (TB == B or TB % 8 == 0), (B, TB)
    grid = (B // TB,)

    out = pl.pallas_call(
        _entity_memory_kernel,
        out_shape=jax.ShapeDtypeStruct((S, B, E), entity.dtype),
        grid=grid,
        in_specs=[
            pl.BlockSpec((TB, dim), lambda b: (b, 0)),        # query tile
            pl.BlockSpec((TB * S, E), lambda b: (b, 0)),      # entity rows of tile
            pl.BlockSpec((dim, 3 * E), lambda b: (0, 0)),     # fused query weights
            pl.BlockSpec((1, 3 * E), lambda b: (0, 0)),       # fused query biases
            pl.BlockSpec((E, E), lambda b: (0, 0)),           # W_context
            pl.BlockSpec((1, E), lambda b: (0, 0)),           # b_context
        ],
        # Output is emitted directly in the final [S, B, E] layout.
        out_specs=pl.BlockSpec((S, TB, E), lambda b: (0, b, 0)),
        scratch_shapes=[pltpu.VMEM((TB * S, E), jnp.float32)],  # uh = H @ Wc + bc
        compiler_params=pltpu.CompilerParams(
            dimension_semantics=("parallel",),
            vmem_limit_bytes=32 * 1024 * 1024,
        ),
    )(inp, entity2d, w_qpack, b_qpack, wc, bc2)
    return out


def reference(inp, entity, p):
    """Pure-JAX mirror of the PyTorch forward (one-step)."""
    q = inp[:, 0, :] if inp.ndim == 3 else inp
    hi = lax.Precision.HIGHEST
    gamma = jax.nn.sigmoid(jnp.dot(q, p["w_gamma"], precision=hi)
                           + p["b_gamma"])[:, None, :]
    wq = (jnp.dot(q, p["w_query"], precision=hi) + p["b_query"])[:, None, :]
    uh = jnp.dot(entity, p["w_context"], precision=hi) + p["b_context"]
    delta = gamma * jax.nn.sigmoid(wq + uh)
    hp = jnp.dot(q, p["w_h"], precision=hi)[:, None, :]
    out = (1.0 - delta) * entity + delta * hp
    return jnp.transpose(out, (1, 0, 2))


if __name__ == "__main__":
    # Small, module-consistent shapes; entity_dim=128 keeps stores lane-dense.
    B, S, DIM, EDIM = 4, 8, 32, 128
    key = jax.random.PRNGKey(0)
    k_in, k_ent, kq, kbq, kc, kbc, kg, kbg, kh = jax.random.split(key, 9)

    inp = jax.random.normal(k_in, (B, 1, DIM), dtype=jnp.float32)       # query
    entity = jax.random.normal(k_ent, (B, S, EDIM), dtype=jnp.float32)  # memory

    scale = 0.1
    params = {
        # stored [in, out] (transposed vs nn.Linear's [out, in])
        "w_query":   scale * jax.random.normal(kq,  (DIM, EDIM), dtype=jnp.float32),
        "b_query":   scale * jax.random.normal(kbq, (EDIM,),     dtype=jnp.float32),
        "w_context": scale * jax.random.normal(kc,  (EDIM, EDIM), dtype=jnp.float32),
        "b_context": scale * jax.random.normal(kbc, (EDIM,),     dtype=jnp.float32),
        "w_gamma":   scale * jax.random.normal(kg,  (DIM, EDIM), dtype=jnp.float32),
        "b_gamma":   scale * jax.random.normal(kbg, (EDIM,),     dtype=jnp.float32),
        "w_h":       scale * jax.random.normal(kh,  (DIM, EDIM), dtype=jnp.float32),
    }

    out = entity_memory_updation(inp, entity, params)
    out = jax.block_until_ready(out)

    ref = reference(inp, entity, params)
    assert out.shape == (S, B, EDIM), out.shape
    max_err = float(jnp.max(jnp.abs(out - ref)))
    assert max_err < 1e-4, f"mismatch vs reference: max abs err = {max_err}"

    print("KERNEL_OK")
</pallas_src>

<mosaic_0001>
module attributes {stable_mosaic.version = 11 : i64} {
  func.func @_entity_memory_kernel(%arg0: i32, %arg1: memref<4x32xf32, #tpu.memory_space<vmem>>, %arg2: memref<32x128xf32, #tpu.memory_space<vmem>>, %arg3: memref<32x384xf32, #tpu.memory_space<vmem>>, %arg4: memref<1x384xf32, #tpu.memory_space<vmem>>, %arg5: memref<128x128xf32, #tpu.memory_space<vmem>>, %arg6: memref<1x128xf32, #tpu.memory_space<vmem>>, %arg7: memref<8x4x128xf32, #tpu.memory_space<vmem>>, %arg8: memref<32x128xf32, #tpu.memory_space<vmem>>) attributes {dimension_semantics = [#tpu.dimension_semantics<parallel>], iteration_bounds = array<i64: 1>, scalar_prefetch = 0 : i64, scratch_operands = 1 : i64, tpu.core_type = #tpu.core_type<tc>, window_params = [{transform_indices = @transform_0, window_bounds = array<i64: 4, 32>}, {transform_indices = @transform_1, window_bounds = array<i64: 32, 128>}, {pipeline_mode = #tpu.pipeline_mode<synchronous>, transform_indices = @transform_2, window_bounds = array<i64: 32, 384>}, {pipeline_mode = #tpu.pipeline_mode<synchronous>, transform_indices = @transform_3, window_bounds = array<i64: 1, 384>}, {pipeline_mode = #tpu.pipeline_mode<synchronous>, transform_indices = @transform_4, window_bounds = array<i64: 128, 128>}, {pipeline_mode = #tpu.pipeline_mode<synchronous>, transform_indices = @transform_5, window_bounds = array<i64: 1, 128>}, {transform_indices = @transform_6, window_bounds = array<i64: 8, 4, 128>}]} {
    %c0 = arith.constant 0 : index
    %c0_0 = arith.constant 0 : index
    %0 = vector.load %arg2[%c0, %c0_0] : memref<32x128xf32, #tpu.memory_space<vmem>>, vector<32x128xf32>
    %c0_1 = arith.constant 0 : index
    %c0_2 = arith.constant 0 : index
    %1 = vector.load %arg5[%c0_1, %c0_2] : memref<128x128xf32, #tpu.memory_space<vmem>>, vector<128x128xf32>
    %cst = arith.constant dense<0.000000e+00> : vector<32x128xf32>
    %2 = tpu.matmul %0, %1, %cst {dimension_numbers = #tpu.dot_dimension_numbers<[1], [0], [0], [1], [0, 0, 1, 1], [], []>} : vector<32x128xf32>, vector<128x128xf32>, vector<32x128xf32> -> vector<32x128xf32>
    %c0_3 = arith.constant 0 : index
    %c0_4 = arith.constant 0 : index
    %3 = vector.load %arg6[%c0_3, %c0_4] : memref<1x128xf32, #tpu.memory_space<vmem>>, vector<1x128xf32>
    %4 = vector.broadcast %3 : vector<1x128xf32> to vector<32x128xf32>
    %5 = arith.addf %2, %4 : vector<32x128xf32>
    %c0_5 = arith.constant 0 : index
    %c0_6 = arith.constant 0 : index
    %6 = vector.load %arg8[%c0_5, %c0_6] : memref<32x128xf32, #tpu.memory_space<vmem>>, vector<32x128xf32>
    tpu.vector_store %arg8[%c0_5, %c0_6], %5 {strides = array<i32>} : memref<32x128xf32, #tpu.memory_space<vmem>>, vector<32x128xf32>,
    %c0_7 = arith.constant 0 : index
    %c0_8 = arith.constant 0 : index
    %7 = vector.load %arg1[%c0_7, %c0_8] : memref<4x32xf32, #tpu.memory_space<vmem>>, vector<4x32xf32>
    %c0_9 = arith.constant 0 : index
    %c0_10 = arith.constant 0 : index
    %8 = vector.load %arg3[%c0_9, %c0_10] : memref<32x384xf32, #tpu.memory_space<vmem>>, vector<32x384xf32>
    %cst_11 = arith.constant dense<0.000000e+00> : vector<4x384xf32>
    %9 = tpu.matmul %7, %8, %cst_11 {dimension_numbers = #tpu.dot_dimension_numbers<[1], [0], [0], [1], [0, 0, 1, 1], [], []>} : vector<4x32xf32>, vector<32x384xf32>, vector<4x384xf32> -> vector<4x384xf32>
    %c0_12 = arith.constant 0 : index
    %c0_13 = arith.constant 0 : index
    %10 = vector.load %arg4[%c0_12, %c0_13] : memref<1x384xf32, #tpu.memory_space<vmem>>, vector<1x384xf32>
    %11 = vector.broadcast %10 : vector<1x384xf32> to vector<4x384xf32>
    %12 = arith.addf %9, %11 : vector<4x384xf32>
    %13 = vector.extract_strided_slice %12 {offsets = [0, 0], sizes = [4, 128], strides = [1, 1]} : vector<4x384xf32> to vector<4x128xf32>
    %14 = arith.negf %13 : vector<4x128xf32>
    %15 = math.exp %14 : vector<4x128xf32>
    %cst_14 = arith.constant 1.000000e+00 : f32
    %16 = vector.broadcast %cst_14 : f32 to vector<4x128xf32>
    %17 = arith.addf %16, %15 : vector<4x128xf32>
    %18 = arith.divf %16, %17 : vector<4x128xf32>
    %19 = vector.extract_strided_slice %12 {offsets = [0, 128], sizes = [4, 128], strides = [1, 1]} : vector<4x384xf32> to vector<4x128xf32>
    %20 = vector.extract_strided_slice %12 {offsets = [0, 256], sizes = [4, 128], strides = [1, 1]} : vector<4x384xf32> to vector<4x128xf32>
    %c0_i32 = arith.constant 0 : i32
    %21 = arith.index_cast %c0_i32 : i32 to index
    %c0_15 = arith.constant 0 : index
    %22 = tpu.strided_load %arg2[%21, %c0_15] {strides = array<i32: 8, 1>} : memref<32x128xf32, #tpu.memory_space<vmem>>, vector<4x128xf32>
    %23 = arith.index_cast %c0_i32 : i32 to index
    %c0_16 = arith.constant 0 : index
    %24 = tpu.strided_load %arg8[%23, %c0_16] {strides = array<i32: 8, 1>} : memref<32x128xf32, #tpu.memory_space<vmem>>, vector<4x128xf32>
    %25 = arith.addf %19, %24 : vector<4x128xf32>
    %26 = arith.negf %25 : vector<4x128xf32>
    %27 = math.exp %26 : vector<4x128xf32>
    %cst_17 = arith.constant 1.000000e+00 : f32
    %28 = vector.broadcast %cst_17 : f32 to vector<4x128xf32>
    %29 = arith.addf %28, %27 : vector<4x128xf32>
    %30 = arith.divf %28, %29 : vector<4x128xf32>
    %31 = arith.mulf %18, %30 : vector<4x128xf32>
    %32 = arith.subf %20, %22 : vector<4x128xf32>
    %33 = arith.mulf %31, %32 : vector<4x128xf32>
    %34 = arith.addf %22, %33 : vector<4x128xf32>
    %35 = arith.index_cast %c0_i32 : i32 to index
    %c0_18 = arith.constant 0 : index
    %c0_19 = arith.constant 0 : index
    %36 = vector.load %arg7[%35, %c0_18, %c0_19] : memref<8x4x128xf32, #tpu.memory_space<vmem>>, vector<1x4x128xf32>
    %37 = vector.shape_cast %36 : vector<1x4x128xf32> to vector<4x128xf32>
    %38 = vector.shape_cast %34 : vector<4x128xf32> to vector<1x4x128xf32>
    tpu.vector_store %arg7[%35, %c0_18, %c0_19], %38 {strides = array<i32>} : memref<8x4x128xf32, #tpu.memory_space<vmem>>, vector<1x4x128xf32>,
    %c1_i32 = arith.constant 1 : i32
    %39 = arith.index_cast %c1_i32 : i32 to index
    %c0_20 = arith.constant 0 : index
    %40 = tpu.strided_load %arg2[%39, %c0_20] {strides = array<i32: 8, 1>} : memref<32x128xf32, #tpu.memory_space<vmem>>, vector<4x128xf32>
    %41 = arith.index_cast %c1_i32 : i32 to index
    %c0_21 = arith.constant 0 : index
    %42 = tpu.strided_load %arg8[%41, %c0_21] {strides = array<i32: 8, 1>} : memref<32x128xf32, #tpu.memory_space<vmem>>, vector<4x128xf32>
    %43 = arith.addf %19, %42 : vector<4x128xf32>
    %44 = arith.negf %43 : vector<4x128xf32>
    %45 = math.exp %44 : vector<4x128xf32>
    %cst_22 = arith.constant 1.000000e+00 : f32
    %46 = vector.broadcast %cst_22 : f32 to vector<4x128xf32>
    %47 = arith.addf %46, %45 : vector<4x128xf32>
    %48 = arith.divf %46, %47 : vector<4x128xf32>
    %49 = arith.mulf %18, %48 : vector<4x128xf32>
    %50 = arith.subf %20, %40 : vector<4x128xf32>
    %51 = arith.mulf %49, %50 : vector<4x128xf32>
    %52 = arith.addf %40, %51 : vector<4x128xf32>
    %53 = arith.index_cast %c1_i32 : i32 to index
    %c0_23 = arith.constant 0 : index
    %c0_24 = arith.constant 0 : index
    %54 = vector.load %arg7[%53, %c0_23, %c0_24] : memref<8x4x128xf32, #tpu.memory_space<vmem>>, vector<1x4x128xf32>
    %55 = vector.shape_cast %54 : vector<1x4x128xf32> to vector<4x128xf32>
    %56 = vector.shape_cast %52 : vector<4x128xf32> to vector<1x4x128xf32>
    tpu.vector_store %arg7[%53, %c0_23, %c0_24], %56 {strides = array<i32>} : memref<8x4x128xf32, #tpu.memory_space<vmem>>, vector<1x4x128xf32>,
    %c2_i32 = arith.constant 2 : i32
    %57 = arith.index_cast %c2_i32 : i32 to index
    %c0_25 = arith.constant 0 : index
    %58 = tpu.strided_load %arg2[%57, %c0_25] {strides = array<i32: 8, 1>} : memref<32x128xf32, #tpu.memory_space<vmem>>, vector<4x128xf32>
    %59 = arith.index_cast %c2_i32 : i32 to index
    %c0_26 = arith.constant 0 : index
    %60 = tpu.strided_load %arg8[%59, %c0_26] {strides = array<i32: 8, 1>} : memref<32x128xf32, #tpu.memory_space<vmem>>, vector<4x128xf32>
    %61 = arith.addf %19, %60 : vector<4x128xf32>
    %62 = arith.negf %61 : vector<4x128xf32>
    %63 = math.exp %62 : vector<4x128xf32>
    %cst_27 = arith.constant 1.000000e+00 : f32
    %64 = vector.broadcast %cst_27 : f32 to vector<4x128xf32>
    %65 = arith.addf %64, %63 : vector<4x128xf32>
    %66 = arith.divf %64, %65 : vector<4x128xf32>
    %67 = arith.mulf %18, %66 : vector<4x128xf32>
    %68 = arith.subf %20, %58 : vector<4x128xf32>
    %69 = arith.mulf %67, %68 : vector<4x128xf32>
    %70 = arith.addf %58, %69 : vector<4x128xf32>
    %71 = arith.index_cast %c2_i32 : i32 to index
    %c0_28 = arith.constant 0 : index
    %c0_29 = arith.constant 0 : index
    %72 = vector.load %arg7[%71, %c0_28, %c0_29] : memref<8x4x128xf32, #tpu.memory_space<vmem>>, vector<1x4x128xf32>
    %73 = vector.shape_cast %72 : vector<1x4x128xf32> to vector<4x128xf32>
    %74 = vector.shape_cast %70 : vector<4x128xf32> to vector<1x4x128xf32>
    tpu.vector_store %arg7[%71, %c0_28, %c0_29], %74 {strides = array<i32>} : memref<8x4x128xf32, #tpu.memory_space<vmem>>, vector<1x4x128xf32>,
    %c3_i32 = arith.constant 3 : i32
    %75 = arith.index_cast %c3_i32 : i32 to index
    %c0_30 = arith.constant 0 : index
    %76 = tpu.strided_load %arg2[%75, %c0_30] {strides = array<i32: 8, 1>} : memref<32x128xf32, #tpu.memory_space<vmem>>, vector<4x128xf32>
    %77 = arith.index_cast %c3_i32 : i32 to index
    %c0_31 = arith.constant 0 : index
    %78 = tpu.strided_load %arg8[%77, %c0_31] {strides = array<i32: 8, 1>} : memref<32x128xf32, #tpu.memory_space<vmem>>, vector<4x128xf32>
    %79 = arith.addf %19, %78 : vector<4x128xf32>
    %80 = arith.negf %79 : vector<4x128xf32>
    %81 = math.exp %80 : vector<4x128xf32>
    %cst_32 = arith.constant 1.000000e+00 : f32
    %82 = vector.broadcast %cst_32 : f32 to vector<4x128xf32>
    %83 = arith.addf %82, %81 : vector<4x128xf32>
    %84 = arith.divf %82, %83 : vector<4x128xf32>
    %85 = arith.mulf %18, %84 : vector<4x128xf32>
    %86 = arith.subf %20, %76 : vector<4x128xf32>
    %87 = arith.mulf %85, %86 : vector<4x128xf32>
    %88 = arith.addf %76, %87 : vector<4x128xf32>
    %89 = arith.index_cast %c3_i32 : i32 to index
    %c0_33 = arith.constant 0 : index
    %c0_34 = arith.constant 0 : index
    %90 = vector.load %arg7[%89, %c0_33, %c0_34] : memref<8x4x128xf32, #tpu.memory_space<vmem>>, vector<1x4x128xf32>
    %91 = vector.shape_cast %90 : vector<1x4x128xf32> to vector<4x128xf32>
    %92 = vector.shape_cast %88 : vector<4x128xf32> to vector<1x4x128xf32>
    tpu.vector_store %arg7[%89, %c0_33, %c0_34], %92 {strides = array<i32>} : memref<8x4x128xf32, #tpu.memory_space<vmem>>, vector<1x4x128xf32>,
    %c4_i32 = arith.constant 4 : i32
    %93 = arith.index_cast %c4_i32 : i32 to index
    %c0_35 = arith.constant 0 : index
    %94 = tpu.strided_load %arg2[%93, %c0_35] {strides = array<i32: 8, 1>} : memref<32x128xf32, #tpu.memory_space<vmem>>, vector<4x128xf32>
    %95 = arith.index_cast %c4_i32 : i32 to index
    %c0_36 = arith.constant 0 : index
    %96 = tpu.strided_load %arg8[%95, %c0_36] {strides = array<i32: 8, 1>} : memref<32x128xf32, #tpu.memory_space<vmem>>, vector<4x128xf32>
    %97 = arith.addf %19, %96 : vector<4x128xf32>
    %98 = arith.negf %97 : vector<4x128xf32>
    %99 = math.exp %98 : vector<4x128xf32>
    %cst_37 = arith.constant 1.000000e+00 : f32
    %100 = vector.broadcast %cst_37 : f32 to vector<4x128xf32>
    %101 = arith.addf %100, %99 : vector<4x128xf32>
    %102 = arith.divf %100, %101 : vector<4x128xf32>
    %103 = arith.mulf %18, %102 : vector<4x128xf32>
    %104 = arith.subf %20, %94 : vector<4x128xf32>
    %105 = arith.mulf %103, %104 : vector<4x128xf32>
    %106 = arith.addf %94, %105 : vector<4x128xf32>
    %107 = arith.index_cast %c4_i32 : i32 to index
    %c0_38 = arith.constant 0 : index
    %c0_39 = arith.constant 0 : index
    %108 = vector.load %arg7[%107, %c0_38, %c0_39] : memref<8x4x128xf32, #tpu.memory_space<vmem>>, vector<1x4x128xf32>
    %109 = vector.shape_cast %108 : vector<1x4x128xf32> to vector<4x128xf32>
    %110 = vector.shape_cast %106 : vector<4x128xf32> to vector<1x4x128xf32>
    tpu.vector_store %arg7[%107, %c0_38, %c0_39], %110 {strides = array<i32>} : memref<8x4x128xf32, #tpu.memory_space<vmem>>, vector<1x4x128xf32>,
    %c5_i32 = arith.constant 5 : i32
    %111 = arith.index_cast %c5_i32 : i32 to index
    %c0_40 = arith.constant 0 : index
    %112 = tpu.strided_load %arg2[%111, %c0_40] {strides = array<i32: 8, 1>} : memref<32x128xf32, #tpu.memory_space<vmem>>, vector<4x128xf32>
    %113 = arith.index_cast %c5_i32 : i32 to index
    %c0_41 = arith.constant 0 : index
    %114 = tpu.strided_load %arg8[%113, %c0_41] {strides = array<i32: 8, 1>} : memref<32x128xf32, #tpu.memory_space<vmem>>, vector<4x128xf32>
    %115 = arith.addf %19, %114 : vector<4x128xf32>
    %116 = arith.negf %115 : vector<4x128xf32>
    %117 = math.exp %116 : vector<4x128xf32>
    %cst_42 = arith.constant 1.000000e+00 : f32
    %118 = vector.broadcast %cst_42 : f32 to vector<4x128xf32>
    %119 = arith.addf %118, %117 : vector<4x128xf32>
    %120 = arith.divf %118, %119 : vector<4x128xf32>
    %121 = arith.mulf %18, %120 : vector<4x128xf32>
    %122 = arith.subf %20, %112 : vector<4x128xf32>
    %123 = arith.mulf %121, %122 : vector<4x128xf32>
    %124 = arith.addf %112, %123 : vector<4x128xf32>
    %125 = arith.index_cast %c5_i32 : i32 to index
    %c0_43 = arith.constant 0 : index
    %c0_44 = arith.constant 0 : index
    %126 = vector.load %arg7[%125, %c0_43, %c0_44] : memref<8x4x128xf32, #tpu.memory_space<vmem>>, vector<1x4x128xf32>
    %127 = vector.shape_cast %126 : vector<1x4x128xf32> to vector<4x128xf32>
    %128 = vector.shape_cast %124 : vector<4x128xf32> to vector<1x4x128xf32>
    tpu.vector_store %arg7[%125, %c0_43, %c0_44], %128 {strides = array<i32>} : memref<8x4x128xf32, #tpu.memory_space<vmem>>, vector<1x4x128xf32>,
    %c6_i32 = arith.constant 6 : i32
    %129 = arith.index_cast %c6_i32 : i32 to index
    %c0_45 = arith.constant 0 : index
    %130 = tpu.strided_load %arg2[%129, %c0_45] {strides = array<i32: 8, 1>} : memref<32x128xf32, #tpu.memory_space<vmem>>, vector<4x128xf32>
    %131 = arith.index_cast %c6_i32 : i32 to index
    %c0_46 = arith.constant 0 : index
    %132 = tpu.strided_load %arg8[%131, %c0_46] {strides = array<i32: 8, 1>} : memref<32x128xf32, #tpu.memory_space<vmem>>, vector<4x128xf32>
    %133 = arith.addf %19, %132 : vector<4x128xf32>
    %134 = arith.negf %133 : vector<4x128xf32>
    %135 = math.exp %134 : vector<4x128xf32>
    %cst_47 = arith.constant 1.000000e+00 : f32
    %136 = vector.broadcast %cst_47 : f32 to vector<4x128xf32>
    %137 = arith.addf %136, %135 : vector<4x128xf32>
    %138 = arith.divf %136, %137 : vector<4x128xf32>
    %139 = arith.mulf %18, %138 : vector<4x128xf32>
    %140 = arith.subf %20, %130 : vector<4x128xf32>
    %141 = arith.mulf %139, %140 : vector<4x128xf32>
    %142 = arith.addf %130, %141 : vector<4x128xf32>
    %143 = arith.index_cast %c6_i32 : i32 to index
    %c0_48 = arith.constant 0 : index
    %c0_49 = arith.constant 0 : index
    %144 = vector.load %arg7[%143, %c0_48, %c0_49] : memref<8x4x128xf32, #tpu.memory_space<vmem>>, vector<1x4x128xf32>
    %145 = vector.shape_cast %144 : vector<1x4x128xf32> to vector<4x128xf32>
    %146 = vector.shape_cast %142 : vector<4x128xf32> to vector<1x4x128xf32>
    tpu.vector_store %arg7[%143, %c0_48, %c0_49], %146 {strides = array<i32>} : memref<8x4x128xf32, #tpu.memory_space<vmem>>, vector<1x4x128xf32>,
    %c7_i32 = arith.constant 7 : i32
    %147 = arith.index_cast %c7_i32 : i32 to index
    %c0_50 = arith.constant 0 : index
    %148 = tpu.strided_load %arg2[%147, %c0_50] {strides = array<i32: 8, 1>} : memref<32x128xf32, #tpu.memory_space<vmem>>, vector<4x128xf32>
    %149 = arith.index_cast %c7_i32 : i32 to index
    %c0_51 = arith.constant 0 : index
    %150 = tpu.strided_load %arg8[%149, %c0_51] {strides = array<i32: 8, 1>} : memref<32x128xf32, #tpu.memory_space<vmem>>, vector<4x128xf32>
    %151 = arith.addf %19, %150 : vector<4x128xf32>
    %152 = arith.negf %151 : vector<4x128xf32>
    %153 = math.exp %152 : vector<4x128xf32>
    %cst_52 = arith.constant 1.000000e+00 : f32
    %154 = vector.broadcast %cst_52 : f32 to vector<4x128xf32>
    %155 = arith.addf %154, %153 : vector<4x128xf32>
    %156 = arith.divf %154, %155 : vector<4x128xf32>
    %157 = arith.mulf %18, %156 : vector<4x128xf32>
    %158 = arith.subf %20, %148 : vector<4x128xf32>
    %159 = arith.mulf %157, %158 : vector<4x128xf32>
    %160 = arith.addf %148, %159 : vector<4x128xf32>
    %161 = arith.index_cast %c7_i32 : i32 to index
    %c0_53 = arith.constant 0 : index
    %c0_54 = arith.constant 0 : index
    %162 = vector.load %arg7[%161, %c0_53, %c0_54] : memref<8x4x128xf32, #tpu.memory_space<vmem>>, vector<1x4x128xf32>
    %163 = vector.shape_cast %162 : vector<1x4x128xf32> to vector<4x128xf32>
    %164 = vector.shape_cast %160 : vector<4x128xf32> to vector<1x4x128xf32>
    tpu.vector_store %arg7[%161, %c0_53, %c0_54], %164 {strides = array<i32>} : memref<8x4x128xf32, #tpu.memory_space<vmem>>, vector<1x4x128xf32>,
    %c8_i32 = arith.constant 8 : i32
    return
  }
  func.func @transform_0(%arg0: i32) -> (i32, i32) {
    %c0_i32 = arith.constant 0 : i32
    %c0_i32_0 = arith.constant 0 : i32
    return %arg0, %c0_i32 : i32, i32
  }
  func.func @transform_1(%arg0: i32) -> (i32, i32) {
    %c0_i32 = arith.constant 0 : i32
    %c0_i32_0 = arith.constant 0 : i32
    return %arg0, %c0_i32 : i32, i32
  }
  func.func @transform_2(%arg0: i32) -> (i32, i32) {
    %c0_i32 = arith.constant 0 : i32
    %c0_i32_0 = arith.constant 0 : i32
    %c0_i32_1 = arith.constant 0 : i32
    return %c0_i32, %c0_i32_0 : i32, i32
  }
  func.func @transform_3(%arg0: i32) -> (i32, i32) {
    %c0_i32 = arith.constant 0 : i32
    %c0_i32_0 = arith.constant 0 : i32
    %c0_i32_1 = arith.constant 0 : i32
    return %c0_i32, %c0_i32_0 : i32, i32
  }
  func.func @transform_4(%arg0: i32) -> (i32, i32) {
    %c0_i32 = arith.constant 0 : i32
    %c0_i32_0 = arith.constant 0 : i32
    %c0_i32_1 = arith.constant 0 : i32
    return %c0_i32, %c0_i32_0 : i32, i32
  }
  func.func @transform_5(%arg0: i32) -> (i32, i32) {
    %c0_i32 = arith.constant 0 : i32
    %c0_i32_0 = arith.constant 0 : i32
    %c0_i32_1 = arith.constant 0 : i32
    return %c0_i32, %c0_i32_0 : i32, i32
  }
  func.func @transform_6(%arg0: i32) -> (i32, i32, i32) {
    %c0_i32 = arith.constant 0 : i32
    %c0_i32_0 = arith.constant 0 : i32
    %c0_i32_1 = arith.constant 0 : i32
    return %c0_i32, %arg0, %c0_i32_0 : i32, i32, i32
  }
}

</mosaic_0001>

<bundles_post_ra>
// kernel: tpu_custom_call.1
= control target key start
LH: loop header
LB: loop body
LE: loop exit
PB: predicated region body
PF: predicated region fallthrough
CT: control target
= control target key end

     0   :  { %11 = vsyncpa [#allocation4], 0  ;;  %s962_s0 = inlined_call_operand.hbm [shape: f32[4,32], index: 0, kind: input, shape index: {}]   ;;  %s963_s1 = inlined_call_operand.hbm [shape: f32[32,128], index: 1, kind: input, shape index: {}]   ;;  %s964_s2 = inlined_call_operand.hbm [shape: f32[32,384], index: 2, kind: input, shape index: {}]   ;;  %s965_s3 = inlined_call_operand.vmem [shape: f32[1,384], index: 3, kind: input, shape index: {}]   ;;  %s966_s4 = inlined_call_operand.hbm [shape: f32[128,128], index: 4, kind: input, shape index: {}]   ;;  %s967_s5 = inlined_call_operand.vmem [shape: f32[1,128], index: 5, kind: input, shape index: {}]   ;;  %s968_s6 = inlined_call_operand.hbm [shape: f32[8,4,128], index: 6, kind: output, shape index: {}]  }
   0x1   :  { %12 = vsyncpa [#allocation7], 0 }
   0x2   :  { %13 = vsyncpa [#allocation10], 0 }
   0x3   :  { %14 = vsyncpa [#allocation5], 0  ;;  %s826_s21 = smov [#allocation6]   ;;  %s708_s25 = scalar_lea.hbm %s963_s1, 512 }
   0x4   :  { %s30_s22 = sshll.u32 %s826_s21, 4  ;;  %p709_p0 = scmp.ne.s32.totalorder %s963_s1, %s708_s25  ;;  %s31_s22 = int_to_ptr.vmem [resolvable:$true] %s30_s22 }
   0x5   :  { %p712_p1 = scmp.lt.u32.totalorder %s708_s25, %s963_s1 }
   0x7   :  { %p714_p2 = pnand %p712_p1, %p709_p0 }
   0x9   :  { %717 = shalt.err (!%p714_p2)
}
   0xa   :  { %s718_s30 = scalar_lea.vmem %s31_s22, 512  ;;  %p723_p4 = scmp.lt.s32.totalorder %s31_s22, %s31_s22 }
   0xb   :  { %p719_p3 = scmp.ne.s32.totalorder %s31_s22, %s718_s30  ;;  %p724_p5 = scmp.lt.s32.totalorder %s718_s30, %s718_s30 }
   0xd   :  { %p725_p6 = por %p724_p5, %p723_p4 }
   0xf   :  { %p726_p7 = pnand %p725_p6, %p719_p3 }
  0x11   :  { %729 = shalt.err (!%p726_p7)
}
  0x12   :  { %s827_s7 = smov 128   ;;  %s828_s8 = smov 8  }
  0x13   :  { %36 = dma.hbm_to_vmem [thread:$0]  %s963_s1, 512, %s31_s22, [#allocation7], %s827_s7, %s827_s7, %s828_s8  }
  0x14   :  { %s829_s11 = smov [#allocation3]   ;;  %s830_s13 = smov [#allocation8]  }
  0x15   :  { %s21_s12 = sshll.u32 %s829_s11, 4  ;;  %s42_s14 = sshll.u32 %s830_s13, 4  ;;  %s22_s12 = int_to_ptr.vmem [resolvable:$true] %s21_s12  ;;  %s43_s14 = int_to_ptr.vmem [resolvable:$true] %s42_s14 }
  0x16   :  { %s730_s17 = scalar_lea.hbm %s962_s0, 64 }
  0x17   :  { %p731_p8 = scmp.ne.s32.totalorder %s962_s0, %s730_s17  ;;  %p734_p9 = scmp.lt.u32.totalorder %s730_s17, %s962_s0 }
  0x19   :  { %p736_p10 = pnand %p734_p9, %p731_p8 }
  0x1b   :  { %739 = shalt.err (!%p736_p10)
}
  0x1c   :  { %s740_s1 = scalar_lea.vmem %s22_s12, 64  ;;  %p745_p12 = scmp.lt.s32.totalorder %s22_s12, %s22_s12 }
  0x1d   :  { %p741_p11 = scmp.ne.s32.totalorder %s22_s12, %s740_s1  ;;  %p746_p13 = scmp.lt.s32.totalorder %s740_s1, %s740_s1 }
  0x1f   :  { %p747_p0 = por %p746_p13, %p745_p12 }
  0x21   :  { %p748_p1 = pnand %p747_p0, %p741_p11 }
  0x23   :  { %751 = shalt.err (!%p748_p1)
}
  0x24   :  { %24 = dma.hbm_to_vmem [thread:$0]  %s962_s0, 64, %s22_s12, [#allocation4]  }
  0x25   :  { %s752_s26 = scalar_lea.hbm %s964_s2, 1536 }
  0x26   :  { %p753_p2 = scmp.ne.s32.totalorder %s964_s2, %s752_s26  ;;  %p756_p3 = scmp.lt.u32.totalorder %s752_s26, %s964_s2 }
  0x28   :  { %p758_p4 = pnand %p756_p3, %p753_p2 }
  0x2a   :  { %761 = shalt.err (!%p758_p4)
}
  0x2b   :  { %s762_s9 = scalar_lea.vmem %s43_s14, 1536  ;;  %p767_p6 = scmp.lt.s32.totalorder %s43_s14, %s43_s14 }
  0x2c   :  { %p763_p5 = scmp.ne.s32.totalorder %s43_s14, %s762_s9  ;;  %p768_p7 = scmp.lt.s32.totalorder %s762_s9, %s762_s9 }
  0x2e   :  { %p769_p8 = por %p768_p7, %p767_p6 }
  0x30   :  { %p770_p9 = pnand %p769_p8, %p763_p5 }
  0x32   :  { %773 = shalt.err (!%p770_p9)
}
  0x33   :  { %s831_s0 = smov 384   ;;  %s832_s10 = smov 24  }
  0x34   :  { %48 = dma.hbm_to_vmem [thread:$0]  %s964_s2, 1536, %s43_s14, [#allocation7], %s831_s0, %s831_s0, %s832_s10  }
  0x35   :  { %s833_s13 = smov [#allocation9]   ;;  %s774_s18 = scalar_lea.hbm %s966_s4, 2048 }
  0x36   :  { %s56_s15 = sshll.u32 %s833_s13, 4  ;;  %p775_p10 = scmp.ne.s32.totalorder %s966_s4, %s774_s18  ;;  %s57_s15 = int_to_ptr.vmem [resolvable:$true] %s56_s15 }
  0x37   :  { %p778_p11 = scmp.lt.u32.totalorder %s774_s18, %s966_s4 }
  0x39   :  { %p780_p12 = pnand %p778_p11, %p775_p10 }
  0x3b   :  { %783 = shalt.err (!%p780_p12)
}
  0x3c   :  { %s784_s22 = scalar_lea.vmem %s57_s15, 2048  ;;  %p789_p0 = scmp.lt.s32.totalorder %s57_s15, %s57_s15 }
  0x3d   :  { %p785_p13 = scmp.ne.s32.totalorder %s57_s15, %s784_s22  ;;  %p790_p1 = scmp.lt.s32.totalorder %s784_s22, %s784_s22 }
  0x3f   :  { %p791_p2 = por %p790_p1, %p789_p0 }
  0x41   :  { %p792_p3 = pnand %p791_p2, %p785_p13 }
  0x43   :  { %795 = shalt.err (!%p792_p3)
}
  0x44   :  { %62 = dma.hbm_to_vmem [thread:$0]  %s966_s4, 2048, %s57_s15, [#allocation10], %s827_s7, %s827_s7, %s828_s8  }
  0x45   :  { %818 = dma.done.wait [#allocation4], 64  }
  0x46   :  { %819 = vsyncadd [#allocation4], 4294967232 }
  0x47   :  { %820 = dma.done.wait [#allocation7], 2048  }
  0x48   :  { %821 = vsyncadd [#allocation7], 4294965248 }
  0x49   :  { %822 = dma.done.wait [#allocation10], 2048  }
  0x4a   :  { %823 = vsyncadd [#allocation10], 4294965248  ;;  %v834_v0 = vmov 0.0   ;;  %v81_v1 = vld [vmem:[#allocation9] sm:$0xff]  ;;  %v82_v2 = vld [vmem:[#allocation9 + $0x8] sm:$0xff]  ;;  %vm223_vm0 = vcmask 261120   ;;  %v208_v52 = vlaneseq }
  0x4b   :  { %291 = vmatprep.mubr.f32.mxu1 %v834_v0  ;;  %v83_v3 = vld [vmem:[#allocation9 + $0x10] sm:$0xff]  ;;  %v612_v4 = vpack.c.bf16 %v82_v2, %v81_v1  ;;  %v84_v5 = vld [vmem:[#allocation9 + $0x18] sm:$0xff]  ;;  %v85_v7 = vld [vmem:[#allocation9 + $0x20] sm:$0xff]  ;;  %v835_v35 = vmov 0.0|0.0   ;;  %vm836_vm1 = vmmov 0  }
  0x4c   :  { %v616_v6 = vpack.c.bf16 %v84_v5, %v83_v3  ;;  %v86_v8 = vld [vmem:[#allocation9 + $0x28] sm:$0xff]  ;;  %v87_v10 = vld [vmem:[#allocation9 + $0x30] sm:$0xff]  ;;  %v77_v11 = vld [vmem:[#allocation6] sm:$0xff]  ;;  %v933_v54 = vshrl.u32 %v208_v52, 7 }
  0x4d   :  { %613 = vmatprep.subr.bf16.mxu0 %v612_v4  ;;  %v620_v9 = vpack.c.bf16 %v86_v8, %v85_v7  ;;  %v88_v12 = vld [vmem:[#allocation9 + $0x38] sm:$0xff]  ;;  %595 = vmatprep.mubr.f32.mxu0 %v77_v11  ;;  %v195_v13 = vld [vmem:[#allocation8 + $0x8] sm:$0xff]  ;;  %v198_v14 = vld [vmem:[#allocation8 + $0x20] sm:$0xff] }
  0x4e   :  { %615 = vmatpush3.bf16.msra.mxu0 %v612_v4  ;;  %v644_v15 = vpack.c.bf16 %v198_v14, %v195_v13  ;;  %v194_v16 = vld [vmem:[#allocation8] sm:$0xff]  ;;  %v197_v17 = vld [vmem:[#allocation8 + $0x18] sm:$0xff]  ;;  %v204_v20 = vld [vmem:[#allocation8 + $0x50] sm:$0xff]  ;;  %v624_v22 = vpack.c.bf16 %v88_v12, %v87_v10  ;;  %v210_v56 = vsub.s32 0, %v933_v54 }
  0x4f   :  { %617 = vmatprep.subr.bf16.mxu0 %v616_v6  ;;  %v646_v18 = vpack.c.bf16 %v197_v17, %v194_v16  ;;  %v201_v19 = vld [vmem:[#allocation8 + $0x38] sm:$0xff]  ;;  %v200_v21 = vld [vmem:[#allocation8 + $0x30] sm:$0xff]  ;;  %v203_v24 = vld [vmem:[#allocation8 + $0x48] sm:$0xff] }
  0x50   :  { %645 = vmatprep.subr.bf16.mxu1 %v644_v15  ;;  %v648_v23 = vpack.c.bf16 %v204_v20, %v201_v19  ;;  %v89_v25 = vld [vmem:[#allocation9 + $0x40] sm:$0xff]  ;;  %v90_v26 = vld [vmem:[#allocation9 + $0x48] sm:$0xff]  ;;  %v650_v27 = vpack.c.bf16 %v203_v24, %v200_v21  ;;  %v196_v28 = vld [vmem:[#allocation8 + $0x10] sm:$0xff] }
  0x51   :  { %647 = vmatpush1.bf16.msra.mxu1 %v646_v18  ;;  %v199_v29 = vld [vmem:[#allocation8 + $0x28] sm:$0xff]  ;;  %v628_v30 = vpack.c.bf16 %v90_v26, %v89_v25  ;;  %v91_v31 = vld [vmem:[#allocation9 + $0x50] sm:$0xff]  ;;  %v92_v32 = vld [vmem:[#allocation9 + $0x58] sm:$0xff] }
  0x52   :  { %619 = vmatpush3.bf16.msra.mxu0 %v616_v6  ;;  %649 = vmatprep.subr.bf16.mxu1 %v648_v23  ;;  %v193_v33 = vld [vmem:[#allocation3] sm:$0xf]  ;;  %v653_v34 = vpack.c.bf16 %v199_v29, %v196_v28  ;;  %v202_v36 = vld [vmem:[#allocation8 + $0x40] sm:$0xff]  ;;  %v632_v38 = vpack.c.bf16 %v92_v32, %v91_v31  ;;  %v94_v40 = vld [vmem:[#allocation9 + $0x68] sm:$0xff] }
  0x53   :  { %621 = vmatprep.subr.bf16.mxu0 %v620_v9  ;;  %v205_v37 = vld [vmem:[#allocation8 + $0x58] sm:$0xff]  ;;  %v93_v39 = vld [vmem:[#allocation9 + $0x60] sm:$0xff]  ;;  %v95_v43 = vld [vmem:[#allocation9 + $0x70] sm:$0xff] }
  0x54   :  { %v656_v41 = vpack.c.bf16 %v205_v37, %v202_v36  ;;  %v636_v42 = vpack.c.bf16 %v94_v40, %v93_v39  ;;  %v96_v44 = vld [vmem:[#allocation9 + $0x78] sm:$0xff]  ;;  %v78_v46 = vld [vmem:[#allocation6 + $0x8] sm:$0xff]  ;;  %v79_v47 = vld [vmem:[#allocation6 + $0x10] sm:$0xff] }
  0x55   :  { %651 = vmatpush1.bf16.msra.mxu1 %v650_v27  ;;  %v640_v45 = vpack.c.bf16 %v96_v44, %v95_v43  ;;  %v80_v48 = vld [vmem:[#allocation6 + $0x18] sm:$0xff] }
  0x56   :  { %623 = vmatpush3.bf16.msra.mxu0 %v620_v9  ;;  %652 = vmatprep.subr.bf16.mxu1 %v835_v35  ;;  %v526_v55 = vld [vmem:[%s967_s5] ss:$0 sm:$0xff] }
  0x57   :  { %625 = vmatprep.subr.bf16.mxu0 %v624_v22  ;;  %v942_v58 = vld [vmem:[%s965_s3] sm:$0x7]  ;;  %s837_s3 = smov [#allocation11]  }
  0x58   :  { %527 = vmatmul.mubr.msk.f32.vlgmr.msra.gmra.mrb[0].mxu1 %vm223_vm0, %v193_v33  ;;  %v211_v62 = vrot.slane %v942_v58, %v210_v56  ;;  %v406_v56 = vld [vmem:[#allocation6 + $0x2] ss:$8 sm:$0xf]  ;;  %s512_s5 = sshll.u32 %s837_s3, 4  ;;  %s513_s5 = int_to_ptr.vmem [resolvable:$true] %s512_s5 }
  0x59   :  { %654 = vmatpush3.bf16.msra.mxu1 %v653_v34  ;;  %609 = vmatprep.mubr.msk.f32.mxu1 %vm836_vm1, %v834_v0  ;;  %v214_v0 = vsub.s32 1, %v933_v54  ;;  %s796_s24 = scalar_lea.vmem %s513_s5, 512  ;;  %p801_p5 = scmp.lt.s32.totalorder %s513_s5, %s513_s5 }
  0x5a   :  { %627 = vmatpush3.bf16.msra.mxu0 %v624_v22  ;;  %655 = vmatprep.subr.bf16.mxu1 %v835_v35  ;;  %v218_v35 = vsub.s32 2, %v933_v54  ;;  %v374_v54 = vld [vmem:[#allocation6] ss:$8 sm:$0xf]  ;;  %p797_p4 = scmp.ne.s32.totalorder %s513_s5, %s796_s24  ;;  %p802_p6 = scmp.lt.s32.totalorder %s796_s24, %s796_s24 }
  0x5b   :  { %629 = vmatprep.subr.bf16.mxu0 %v628_v30  ;;  %v215_v5 = vrot.slane %v942_v58, %v214_v0 }
  0x5c   :  { %v219_v44 = vrot.slane %v942_v58, %v218_v35  ;;  %p803_p7 = por %p802_p6, %p801_p5 }
  0x5d   :  { %657 = vmatpush3.bf16.msra.mxu1 %v656_v41 }
  0x5e   :  { %631 = vmatpush3.bf16.msra.mxu0 %v628_v30  ;;  %p804_p8 = pnand %p803_p7, %p797_p4 }
  0x5f   :  { %633 = vmatprep.subr.bf16.mxu0 %v632_v38 }
  0x60   :  { %610 = vmatmul.mubr.msk.f32.vlgmr.msra.gmra.mrb[2].mxu1 %vm223_vm0, %v193_v33 }
  0x62   :  { %635 = vmatpush3.bf16.msra.mxu0 %v632_v38 }
  0x63   :  { %637 = vmatprep.subr.bf16.mxu0 %v636_v42 }
  0x66   :  { %639 = vmatpush3.bf16.msra.mxu0 %v636_v42 }
  0x67   :  { %641 = vmatprep.subr.bf16.mxu0 %v640_v45 }
  0x6a   :  { %643 = vmatpush3.bf16.msra.mxu0 %v640_v45 }
  0x6d   :  { %596 = vmatmul.mubr.f32.vlgmr.msra.gmra.mrb[0].mxu0 %v78_v46 }
  0x6e   :  { %598 = vmatprep.mubr.f32.mxu0 %v79_v47 }
  0x71   :  { %599 = vmatmul.mubr.f32.gmra.mrb[2].mxu0 %v80_v48 }
 0x12b   :  { %v293_v49 = vpop.f32.mrb[0].mxu1 }
 0x12c   :  { %v295_v50 = vpop.f32.mrb[1].mxu1  ;;  %v294_v4 = vadd.f32 %v293_v49, %v211_v62  ;;  %v440_v62 = vld [vmem:[#allocation6 + $0x4] ss:$8 sm:$0xf] }
 0x12d   :  { %v296_v7 = vadd.f32 %v295_v50, %v215_v5 }
 0x12e   :  { %v529_v6 = vmul.f32 -1.442695, %v294_v4 }
 0x130   :  { %672 = vpow2.f32 %v529_v6  ;;  %v474_v6 = vld [vmem:[#allocation6 + $0x6] ss:$8 sm:$0xf] }
 0x133   :  { %v931_v51 = vpop.f32.mrb[2].mxu1 }
 0x134   :  { %v611_v53 = vpop.f32.mrb[3].mxu1 }
 0x135   :  { %v365_v53 = vadd.f32 %v931_v51, %v219_v44 }
 0x137   :  { %v384_v58 = vsub.f32 %v365_v53, %v374_v54 }
 0x13a   :  { %v673_v32 = vpop.eup %672 }
 0x13b   :  { %v371_v33 = vadd.f32 1.0, %v673_v32 }
 0x140   :  { %v597_v57 = vpop.f32.mrb[0].mxu0 }
 0x141   :  { %v176_v59 = vadd.f32 %v597_v57, %v526_v55  ;;  %v170_v60 = vpop.f32.mrb[1].mxu0 }
 0x142   :  { %v171_v61 = vadd.f32 %v526_v55, %v170_v60 }
 0x143   :  { %190 = vst [vmem:[#allocation2 + $0x8] sm:$0xff] %v176_v59  ;;  %v423_v59 = vld [vmem:[#allocation6 + $0x3] ss:$8 sm:$0xf] }
 0x144   :  { %189 = vst [vmem:[#allocation2] sm:$0xff] %v171_v61  ;;  %v600_v63 = vpop.f32.mrb[2].mxu0  ;;  %v434_v5 = vsub.f32 %v365_v53, %v423_v59 }
 0x145   :  { %v186_v1 = vadd.f32 %v600_v63, %v526_v55  ;;  %v180_v2 = vpop.f32.mrb[3].mxu0 }
 0x146   :  { %v181_v3 = vadd.f32 %v526_v55, %v180_v2  ;;  %v389_v55 = vld [vmem:[#allocation6 + $0x1] ss:$8 sm:$0xf]  ;;  %v457_v2 = vld [vmem:[#allocation6 + $0x5] ss:$8 sm:$0xf] }
 0x147   :  { %192 = vst [vmem:[#allocation2 + $0x18] sm:$0xff] %v186_v1  ;;  %v400_v61 = vsub.f32 %v365_v53, %v389_v55  ;;  %v417_v1 = vsub.f32 %v365_v53, %v406_v56 }
 0x148   :  { %191 = vst [vmem:[#allocation2 + $0x10] sm:$0xff] %v181_v3 }
 0x14f   :  { %v375_v8 = vld [vmem:[#allocation2] ss:$8 sm:$0xf]  ;;  %v391_v9 = vld [vmem:[#allocation2 + $0x1] ss:$8 sm:$0xf] }
 0x150   :  { %v376_v10 = vadd.f32 %v375_v8, %v296_v7  ;;  %v392_v11 = vadd.f32 %v391_v9, %v296_v7  ;;  %v408_v12 = vld [vmem:[#allocation2 + $0x2] ss:$8 sm:$0xf]  ;;  %v425_v13 = vld [vmem:[#allocation2 + $0x3] ss:$8 sm:$0xf]  ;;  %v451_v9 = vsub.f32 %v365_v53, %v440_v62 }
 0x151   :  { %v409_v14 = vadd.f32 %v408_v12, %v296_v7  ;;  %v426_v15 = vadd.f32 %v425_v13, %v296_v7  ;;  %v442_v16 = vld [vmem:[#allocation2 + $0x4] ss:$8 sm:$0xf]  ;;  %v459_v17 = vld [vmem:[#allocation2 + $0x5] ss:$8 sm:$0xf] }
 0x152   :  { %v530_v18 = vmul.f32 -1.442695, %v376_v10  ;;  %v531_v19 = vmul.f32 -1.442695, %v392_v11  ;;  %v443_v20 = vadd.f32 %v442_v16, %v296_v7  ;;  %v460_v21 = vadd.f32 %v459_v17, %v296_v7 }
 0x153   :  { %v532_v22 = vmul.f32 -1.442695, %v409_v14  ;;  %v533_v23 = vmul.f32 -1.442695, %v426_v15  ;;  %v468_v14 = vsub.f32 %v365_v53, %v457_v2 }
 0x154   :  { %674 = vpow2.f32 %v530_v18  ;;  %v534_v24 = vmul.f32 -1.442695, %v443_v20  ;;  %v535_v25 = vmul.f32 -1.442695, %v460_v21 }
 0x155   :  { %676 = vpow2.f32 %v531_v19  ;;  %v476_v26 = vld [vmem:[#allocation2 + $0x6] ss:$8 sm:$0xf]  ;;  %v493_v27 = vld [vmem:[#allocation2 + $0x7] ss:$8 sm:$0xf]  ;;  %v485_v19 = vsub.f32 %v365_v53, %v474_v6 }
 0x156   :  { %678 = vpow2.f32 %v532_v22  ;;  %v477_v28 = vadd.f32 %v476_v26, %v296_v7  ;;  %v494_v29 = vadd.f32 %v493_v27, %v296_v7  ;;  %v491_v10 = vld [vmem:[#allocation6 + $0x7] ss:$8 sm:$0xf] }
 0x157   :  { %680 = vpow2.f32 %v533_v23 }
 0x158   :  { %682 = vpow2.f32 %v534_v24  ;;  %v536_v30 = vmul.f32 -1.442695, %v477_v28  ;;  %v537_v31 = vmul.f32 -1.442695, %v494_v29  ;;  %v502_v24 = vsub.f32 %v365_v53, %v491_v10 }
 0x159   :  { %684 = vpow2.f32 %v535_v25 }
 0x15a   :  { %686 = vpow2.f32 %v536_v30 }
 0x15b   :  { %688 = vpow2.f32 %v537_v31 }
 0x15c   :  { %690 = vrcp.f32 %v371_v33 }
 0x15e   :  { %v675_v34 = vpop.eup %674 }
 0x15f   :  { %v677_v36 = vpop.eup %676  ;;  %v380_v37 = vadd.f32 1.0, %v675_v34 }
 0x160   :  { %v679_v38 = vpop.eup %678  ;;  %v396_v39 = vadd.f32 1.0, %v677_v36 }
 0x161   :  { %v681_v40 = vpop.eup %680  ;;  %692 = vrcp.f32 %v380_v37  ;;  %v413_v41 = vadd.f32 1.0, %v679_v38 }
 0x162   :  { %v683_v42 = vpop.eup %682  ;;  %694 = vrcp.f32 %v396_v39  ;;  %v430_v43 = vadd.f32 1.0, %v681_v40 }
 0x163   :  { %v685_v45 = vpop.eup %684  ;;  %696 = vrcp.f32 %v413_v41  ;;  %v447_v46 = vadd.f32 1.0, %v683_v42 }
 0x164   :  { %v687_v47 = vpop.eup %686  ;;  %698 = vrcp.f32 %v430_v43  ;;  %v464_v48 = vadd.f32 1.0, %v685_v45 }
 0x165   :  { %v689_v49 = vpop.eup %688  ;;  %700 = vrcp.f32 %v447_v46  ;;  %v481_v50 = vadd.f32 1.0, %v687_v47 }
 0x166   :  { %702 = vrcp.f32 %v464_v48  ;;  %v498_v52 = vadd.f32 1.0, %v689_v49  ;;  %v691_v57 = vpop.eup %690 }
 0x167   :  { %704 = vrcp.f32 %v481_v50 }
 0x168   :  { %706 = vrcp.f32 %v498_v52 }
 0x16b   :  { %v693_v60 = vpop.eup %692 }
 0x16c   :  { %v695_v63 = vpop.eup %694  ;;  %v383_v0 = vmul.f32 %v693_v60, %v691_v57 }
 0x16d   :  { %v697_v3 = vpop.eup %696  ;;  %v399_v4 = vmul.f32 %v695_v63, %v691_v57 }
 0x16e   :  { %v699_v51 = vpop.eup %698  ;;  %v385_v7 = vmul.f32 %v384_v58, %v383_v0  ;;  %v416_v8 = vmul.f32 %v697_v3, %v691_v57 }
 0x16f   :  { %v701_v11 = vpop.eup %700  ;;  %v401_v12 = vmul.f32 %v400_v61, %v399_v4  ;;  %v433_v13 = vmul.f32 %v699_v51, %v691_v57 }
 0x170   :  { %v703_v15 = vpop.eup %702  ;;  %v386_v16 = vadd.f32 %v385_v7, %v374_v54  ;;  %v418_v17 = vmul.f32 %v417_v1, %v416_v8  ;;  %v450_v18 = vmul.f32 %v701_v11, %v691_v57 }
 0x171   :  { %v705_v20 = vpop.eup %704  ;;  %v402_v21 = vadd.f32 %v401_v12, %v389_v55  ;;  %v435_v22 = vmul.f32 %v434_v5, %v433_v13  ;;  %v467_v23 = vmul.f32 %v703_v15, %v691_v57 }
 0x172   :  { %v707_v25 = vpop.eup %706  ;;  %v419_v26 = vadd.f32 %v418_v17, %v406_v56  ;;  %v452_v27 = vmul.f32 %v451_v9, %v450_v18  ;;  %v484_v28 = vmul.f32 %v705_v20, %v691_v57  ;;  %387 = vst [vmem:[#allocation11] sm:$0xf] %v386_v16 }
 0x173   :  { %v436_v29 = vadd.f32 %v435_v22, %v423_v59  ;;  %v469_v30 = vmul.f32 %v468_v14, %v467_v23  ;;  %v501_v31 = vmul.f32 %v707_v25, %v691_v57  ;;  %404 = vst [vmem:[#allocation11 + $0x4] sm:$0xf] %v402_v21 }
 0x174   :  { %v453_v32 = vadd.f32 %v452_v27, %v440_v62  ;;  %v486_v33 = vmul.f32 %v485_v19, %v484_v28  ;;  %421 = vst [vmem:[#allocation11 + $0x8] sm:$0xf] %v419_v26 }
 0x175   :  { %v470_v34 = vadd.f32 %v469_v30, %v457_v2  ;;  %v503_v35 = vmul.f32 %v502_v24, %v501_v31  ;;  %438 = vst [vmem:[#allocation11 + $0xc] sm:$0xf] %v436_v29 }
 0x176   :  { %v487_v36 = vadd.f32 %v486_v33, %v474_v6  ;;  %455 = vst [vmem:[#allocation11 + $0x10] sm:$0xf] %v453_v32 }
 0x177   :  { %v504_v37 = vadd.f32 %v503_v35, %v491_v10  ;;  %472 = vst [vmem:[#allocation11 + $0x14] sm:$0xf] %v470_v34 }
 0x178   :  { %489 = vst [vmem:[#allocation11 + $0x18] sm:$0xf] %v487_v36 }
 0x179   :  { %506 = vst [vmem:[#allocation11 + $0x1c] sm:$0xf] %v504_v37 }
 0x17a   :  { %807 = shalt.err (!%p804_p8)
}
 0x17b   :  { %s808_s27 = scalar_lea.hbm %s968_s6, 512 }
 0x17c   :  { %p809_p9 = scmp.ne.s32.totalorder %s968_s6, %s808_s27  ;;  %p812_p10 = scmp.lt.u32.totalorder %s808_s27, %s968_s6 }
 0x17e   :  { %p814_p11 = pnand %p812_p10, %p809_p9 }
 0x180   :  { %817 = shalt.err (!%p814_p11)
}
 0x181   :  { %s838_s0 = smov 64   ;;  %s839_s10 = smov 4  }
 0x182   :  { %518 = dma.vmem_to_hbm [thread:$0]  %s513_s5, 512, %s968_s6, [#allocation5], %s838_s0, %s838_s0, %s839_s10  }
 0x183   :  { %824 = dma.done.wait [#allocation5], 512  }
 0x184   :  { %825 = vsyncadd [#allocation5], 4294966784 }
 0x185   :  { %522 = vsyncpa [#allocation4], 1 }
 0x186   :  { %523 = vsyncpa [#allocation7], 1 }
 0x187   :  { %524 = vsyncpa [#allocation10], 1 }
 0x188   :  { %525 = vsyncpa [#allocation5], 1 }

</bundles_post_ra>
